<compile_context>
chip_gen: v5e
topology: v5e:2x2
jax: 0.10.0
libtpu: 0.0.40
codegen_flags: <defaults>
</compile_context>

<pallas_src>
import jax
import jax.numpy as jnp
from jax.experimental import pallas as pl
from jax.experimental.pallas import tpu as pltpu


# ----------------------------------------------------------------------------
# Kernel: fused  Linear -> ReLU -> Linear -> Tanh -> Linear  for one batch tile
# ----------------------------------------------------------------------------
def wrapper_mlp_kernel(x_ref, w1_ref, b1_ref, w2_ref, b2_ref, w3_ref, b3_ref,
                       o_ref):
    # net_a: Linear(IN -> H1) + ReLU   (bf16/f32 operands, f32 accumulation)
    h = jnp.dot(x_ref[...], w1_ref[...],
                preferred_element_type=jnp.float32) + b1_ref[...]
    h = jnp.maximum(h, 0.0)

    # net_b: Linear(H1 -> H2) + Tanh + Linear(H2 -> OUT)
    h = jnp.dot(h.astype(w2_ref.dtype), w2_ref[...],
                preferred_element_type=jnp.float32) + b2_ref[...]
    h = jnp.tanh(h)
    h = jnp.dot(h.astype(w3_ref.dtype), w3_ref[...],
                preferred_element_type=jnp.float32) + b3_ref[...]

    # Unpadded (tile, 16) store: masked vst, but 8x fewer HBM bytes than a
    # 128-lane-padded f32 slab.
    o_ref[...] = h.astype(o_ref.dtype)


# ----------------------------------------------------------------------------
# One-time parameter preparation (hoisted out of the per-call path)
# ----------------------------------------------------------------------------
def prepare_wrapper_params(params, weight_dtype=jnp.bfloat16):
    """Transpose to (in, out), cast matmul operands, reshape biases. Done once."""
    w1, b1 = params["net_a.0.weight"], params["net_a.0.bias"]   # (H1, IN), (H1,)
    w2, b2 = params["net_b.0.weight"], params["net_b.0.bias"]   # (H2, H1), (H2,)
    w3, b3 = params["net_b.2.weight"], params["net_b.2.bias"]   # (OUT, H2), (OUT,)
    return (
        jnp.transpose(w1).astype(weight_dtype),      # (IN,  H1)
        b1.reshape(1, -1).astype(jnp.float32),       # (1,   H1)
        jnp.transpose(w2).astype(weight_dtype),      # (H1,  H2)
        b2.reshape(1, -1).astype(jnp.float32),       # (1,   H2)
        jnp.transpose(w3).astype(weight_dtype),      # (H2,  OUT)
        b3.reshape(1, -1).astype(jnp.float32),       # (1,   OUT)
    )


def _choose_tile(B, max_tile):
    """Largest multiple-of-8 tile <= max_tile that divides B, preferring >= 4
    grid steps (>= 2 per v7x TensorCore), then >= 2; fall back to ~B/2 + tail."""
    for min_blocks in (4, 2):
        cap = min(max_tile, B // min_blocks)
        cap -= cap % 8
        for t in range(cap, 7, -8):
            if B % t == 0:
                return t
    t = min(max_tile, max(8, B // 2))
    t -= t % 8
    return max(t, 8)


def _single_block_call(x_in, prep, out_dtype, OUT):
    """Gridless single-block path: no pipeline, no padding, no trailing ops."""
    B = x_in.shape[0]
    return pl.pallas_call(
        wrapper_mlp_kernel,
        out_shape=jax.ShapeDtypeStruct((B, OUT), out_dtype),
    )(x_in, *prep)


# ----------------------------------------------------------------------------
# Forward: Wrapper.forward(x) = net_b(net_a(x)) as fused Pallas kernel(s)
# ----------------------------------------------------------------------------
def wrapper_forward(x, prep, *, batch_tile=1024, small_batch=256):
    """x: (B, IN) float32; prep: output of prepare_wrapper_params."""
    w1, b1, w2, b2, w3, b3 = prep
    B, IN = x.shape
    H1, H2, OUT = w1.shape[1], w2.shape[1], w3.shape[1]
    out_dtype = x.dtype

    x_in = x.astype(w1.dtype)   # bf16 by default: halves the x read DMA

    # ---- small-batch / latency path: single block, no grid ------------------
    if B < small_batch:
        return _single_block_call(x_in, prep, out_dtype, OUT)

    # ---- throughput path: 1-D "parallel" grid over the batch ---------------
    tile = _choose_tile(B, batch_tile)
    n_main = B // tile
    b_main = n_main * tile
    tail = B - b_main

    full = lambda r, c: pl.BlockSpec((r, c), lambda i: (0, 0))  # grid-invariant

    out_main = pl.pallas_call(
        wrapper_mlp_kernel,
        out_shape=jax.ShapeDtypeStruct((b_main, OUT), out_dtype),
        grid=(n_main,),
        in_specs=[
            pl.BlockSpec((tile, IN), lambda i: (i, 0)),   # x batch tile
            full(IN, H1), full(1, H1),                    # layer 1
            full(H1, H2), full(1, H2),                    # layer 2
            full(H2, OUT), full(1, OUT),                  # layer 3 (unpadded)
        ],
        out_specs=pl.BlockSpec((tile, OUT), lambda i: (i, 0)),
        compiler_params=pltpu.CompilerParams(
            dimension_semantics=("parallel",)),           # megacore sharding
    )(x_in[:b_main], *prep)

    if tail == 0:
        return out_main

    # Ragged tail: tiny gridless call instead of padding the whole batch.
    out_tail = _single_block_call(x_in[b_main:], prep, out_dtype, OUT)
    return jnp.concatenate([out_main, out_tail], axis=0)


def make_wrapper_forward(params, *, weight_dtype=jnp.bfloat16,
                         batch_tile=1024, small_batch=256):
    prep = prepare_wrapper_params(params, weight_dtype)
    def fwd(x):
        return wrapper_forward(x, prep, batch_tile=batch_tile,
                               small_batch=small_batch)
    return fwd


# ----------------------------------------------------------------------------
# Deterministic parameter init (mimics nn.Linear shapes; synthetic values)
# ----------------------------------------------------------------------------
def init_params(key, in_dim, h1, h2, out_dim):
    ks = jax.random.split(key, 6)

    def lin(kw, kb, fan_in, fan_out):
        bound = 1.0 / jnp.sqrt(fan_in)
        w = jax.random.uniform(kw, (fan_out, fan_in), jnp.float32, -bound, bound)
        b = jax.random.uniform(kb, (fan_out,), jnp.float32, -bound, bound)
        return w, b

    w1, b1 = lin(ks[0], ks[1], in_dim, h1)
    w2, b2 = lin(ks[2], ks[3], h1, h2)
    w3, b3 = lin(ks[4], ks[5], h2, out_dim)
    return {
        "net_a.0.weight": w1, "net_a.0.bias": b1,
        "net_b.0.weight": w2, "net_b.0.bias": b2,
        "net_b.2.weight": w3, "net_b.2.bias": b3,
    }


# Pure-JAX reference of Wrapper.forward (mirrors the kernel's dtype handling).
def wrapper_forward_ref(x, p, weight_dtype=jnp.float32):
    wd, f32 = weight_dtype, jnp.float32
    h = jnp.dot(x.astype(wd), p["net_a.0.weight"].T.astype(wd),
                preferred_element_type=f32) + p["net_a.0.bias"]
    h = jnp.maximum(h, 0.0)
    h = jnp.dot(h.astype(wd), p["net_b.0.weight"].T.astype(wd),
                preferred_element_type=f32) + p["net_b.0.bias"]
    h = jnp.tanh(h)
    h = jnp.dot(h.astype(wd), p["net_b.2.weight"].T.astype(wd),
                preferred_element_type=f32) + p["net_b.2.bias"]
    return h


if __name__ == "__main__":
    key = jax.random.PRNGKey(0)
    k_x, k_p, k_xb, k_xr = jax.random.split(key, 4)

    B, IN, H1, H2, OUT = 8, 32, 64, 64, 16
    x = jax.random.normal(k_x, (B, IN), jnp.float32)
    params = init_params(k_p, IN, H1, H2, OUT)

    # 1) Small-batch latency path, default bf16 MXU operands (f32 accumulation).
    fwd_bf16 = make_wrapper_forward(params)                      # bf16 default
    ref_bf = wrapper_forward_ref(x, params, weight_dtype=jnp.bfloat16)
    out_bf = jax.block_until_ready(fwd_bf16(x))
    assert out_bf.shape == (B, OUT)
    assert jnp.allclose(out_bf, ref_bf, atol=2e-2, rtol=2e-2), "bf16 small-B mismatch"

    # 2) f32 escape hatch (full-fidelity path).
    fwd_f32 = make_wrapper_forward(params, weight_dtype=jnp.float32)
    ref = wrapper_forward_ref(x, params)
    out = jax.block_until_ready(fwd_f32(x))
    assert jnp.allclose(out, ref, atol=1e-4, rtol=1e-4), "f32 small-B mismatch"

    # 3) Throughput path: parallel 1-D grid over batch (tile chosen so the grid
    #    has >= 4 steps -> both v7x TensorCores busy), unpadded 16-wide output.
    Bt = 1024
    xt = jax.random.normal(k_xb, (Bt, IN), jnp.float32)
    reft = wrapper_forward_ref(xt, params, weight_dtype=jnp.bfloat16)
    outt = jax.block_until_ready(fwd_bf16(xt))
    assert outt.shape == (Bt, OUT)
    assert jnp.allclose(outt, reft, atol=2e-2, rtol=2e-2), "tiled path mismatch"

    # 4) Ragged batch: main grid + tiny tail call (no whole-batch padding).
    Br = 516
    xr = jax.random.normal(k_xr, (Br, IN), jnp.float32)
    refr = wrapper_forward_ref(xr, params, weight_dtype=jnp.bfloat16)
    outr = jax.block_until_ready(fwd_bf16(xr))
    assert outr.shape == (Br, OUT)
    assert jnp.allclose(outr, refr, atol=2e-2, rtol=2e-2), "ragged tail mismatch"

    print("KERNEL_OK")
</pallas_src>

<mosaic_0001>
module attributes {stable_mosaic.version = 11 : i64} {
  func.func @wrapper_mlp_kernel(%arg0: memref<8x32xbf16, #tpu.memory_space<vmem>>, %arg1: memref<32x64xbf16, #tpu.memory_space<vmem>>, %arg2: memref<1x64xf32, #tpu.memory_space<vmem>>, %arg3: memref<64x64xbf16, #tpu.memory_space<vmem>>, %arg4: memref<1x64xf32, #tpu.memory_space<vmem>>, %arg5: memref<64x16xbf16, #tpu.memory_space<vmem>>, %arg6: memref<1x16xf32, #tpu.memory_space<vmem>>, %arg7: memref<8x16xf32, #tpu.memory_space<vmem>>) attributes {dimension_semantics = [], scalar_prefetch = 0 : i64, scratch_operands = 0 : i64, tpu.core_type = #tpu.core_type<tc>} {
    %c0 = arith.constant 0 : index
    %c0_0 = arith.constant 0 : index
    %0 = vector.load %arg0[%c0, %c0_0] : memref<8x32xbf16, #tpu.memory_space<vmem>>, vector<8x32xbf16>
    %c0_1 = arith.constant 0 : index
    %c0_2 = arith.constant 0 : index
    %1 = vector.load %arg1[%c0_1, %c0_2] : memref<32x64xbf16, #tpu.memory_space<vmem>>, vector<32x64xbf16>
    %cst = arith.constant dense<0.000000e+00> : vector<8x64xf32>
    %2 = tpu.matmul %0, %1, %cst {dimension_numbers = #tpu.dot_dimension_numbers<[1], [0], [0], [1], [0, 0, 1, 1], [], []>} : vector<8x32xbf16>, vector<32x64xbf16>, vector<8x64xf32> -> vector<8x64xf32>
    %c0_3 = arith.constant 0 : index
    %c0_4 = arith.constant 0 : index
    %3 = vector.load %arg2[%c0_3, %c0_4] : memref<1x64xf32, #tpu.memory_space<vmem>>, vector<1x64xf32>
    %4 = vector.broadcast %3 : vector<1x64xf32> to vector<8x64xf32>
    %5 = arith.addf %2, %4 : vector<8x64xf32>
    %cst_5 = arith.constant 0.000000e+00 : f32
    %6 = vector.broadcast %cst_5 : f32 to vector<8x64xf32>
    %7 = arith.maximumf %5, %6 : vector<8x64xf32>
    %8 = arith.truncf %7 : vector<8x64xf32> to vector<8x64xbf16>
    %c0_6 = arith.constant 0 : index
    %c0_7 = arith.constant 0 : index
    %9 = vector.load %arg3[%c0_6, %c0_7] : memref<64x64xbf16, #tpu.memory_space<vmem>>, vector<64x64xbf16>
    %cst_8 = arith.constant dense<0.000000e+00> : vector<8x64xf32>
    %10 = tpu.matmul %8, %9, %cst_8 {dimension_numbers = #tpu.dot_dimension_numbers<[1], [0], [0], [1], [0, 0, 1, 1], [], []>} : vector<8x64xbf16>, vector<64x64xbf16>, vector<8x64xf32> -> vector<8x64xf32>
    %c0_9 = arith.constant 0 : index
    %c0_10 = arith.constant 0 : index
    %11 = vector.load %arg4[%c0_9, %c0_10] : memref<1x64xf32, #tpu.memory_space<vmem>>, vector<1x64xf32>
    %12 = vector.broadcast %11 : vector<1x64xf32> to vector<8x64xf32>
    %13 = arith.addf %10, %12 : vector<8x64xf32>
    %14 = math.tanh %13 : vector<8x64xf32>
    %15 = arith.truncf %14 : vector<8x64xf32> to vector<8x64xbf16>
    %c0_11 = arith.constant 0 : index
    %c0_12 = arith.constant 0 : index
    %16 = vector.load %arg5[%c0_11, %c0_12] : memref<64x16xbf16, #tpu.memory_space<vmem>>, vector<64x16xbf16>
    %cst_13 = arith.constant dense<0.000000e+00> : vector<8x16xf32>
    %17 = tpu.matmul %15, %16, %cst_13 {dimension_numbers = #tpu.dot_dimension_numbers<[1], [0], [0], [1], [0, 0, 1, 1], [], []>} : vector<8x64xbf16>, vector<64x16xbf16>, vector<8x16xf32> -> vector<8x16xf32>
    %c0_14 = arith.constant 0 : index
    %c0_15 = arith.constant 0 : index
    %18 = vector.load %arg6[%c0_14, %c0_15] : memref<1x16xf32, #tpu.memory_space<vmem>>, vector<1x16xf32>
    %19 = vector.broadcast %18 : vector<1x16xf32> to vector<8x16xf32>
    %20 = arith.addf %17, %19 : vector<8x16xf32>
    %c0_16 = arith.constant 0 : index
    %c0_17 = arith.constant 0 : index
    %21 = vector.load %arg7[%c0_16, %c0_17] : memref<8x16xf32, #tpu.memory_space<vmem>>, vector<8x16xf32>
    tpu.vector_store %arg7[%c0_16, %c0_17], %20 {strides = array<i32>} : memref<8x16xf32, #tpu.memory_space<vmem>>, vector<8x16xf32>,
    return
  }
}

</mosaic_0001>

<bundles_post_ra>
// kernel: tpu_custom_call.1
= control target key start
LH: loop header
LB: loop body
LE: loop exit
PB: predicated region body
PF: predicated region fallthrough
CT: control target
= control target key end

     0   :  { %12 = vsyncpa [#allocation3], 0  ;;  %s412_s0 = inlined_call_operand.vmem [shape: bf16[8,32], index: 0, kind: input, shape index: {}]   ;;  %s413_s1 = inlined_call_operand.hbm [shape: bf16[32,64], index: 1, kind: input, shape index: {}]   ;;  %s414_s2 = inlined_call_operand.vmem [shape: f32[1,64], index: 2, kind: input, shape index: {}]   ;;  %s415_s3 = inlined_call_operand.vmem [shape: bf16[64,64], index: 3, kind: input, shape index: {}]   ;;  %s416_s4 = inlined_call_operand.vmem [shape: f32[1,64], index: 4, kind: input, shape index: {}]   ;;  %s417_s5 = inlined_call_operand.vmem [shape: bf16[64,16], index: 5, kind: input, shape index: {}]   ;;  %s418_s6 = inlined_call_operand.vmem [shape: f32[1,16], index: 6, kind: input, shape index: {}]   ;;  %s419_s7 = inlined_call_operand.hbm [shape: f32[8,16], index: 7, kind: output, shape index: {}]  }
   0x1   :  { %13 = vsyncpa [#allocation4], 0  ;;  %s20_s26 = sshll.u32 %s413_s1, 4  ;;  %s324_s27 = smov [#allocation2]   ;;  %s21_s26 = int_to_ptr.hbm [resolvable:$true] %s20_s26 }
   0x2   :  { %s22_s28 = sshll.u32 %s324_s27, 4  ;;  %s325_s29 = smov 64   ;;  %s23_s28 = int_to_ptr.vmem [resolvable:$true] %s22_s28 }
   0x3   :  { %s326_s30 = smov 4  }
   0x4   :  { %28 = dma.hbm_to_vmem [thread:$0]  %s21_s26, 256, %s23_s28, [#allocation3], %s325_s29, %s325_s29, %s326_s30  }
   0x5   :  { %320 = dma.done.wait [#allocation3], 256  }
   0x6   :  { %321 = vsyncadd [#allocation3], 4294967040  ;;  %v254_v0 = vld [vmem:[#allocation2 + $0x8] sm:$0xff]  ;;  %v258_v1 = vld [vmem:[%s415_s3 + $0x18] sm:$0xff]  ;;  %vm65_vm0 = vcmask 261120   ;;  %vm120_vm1 = vcmask 523264  }
   0x7   :  { %75 = vmatpush.bf16.msra.mxu0 %v254_v0  ;;  %v253_v2 = vld [vmem:[#allocation2] sm:$0xff]  ;;  %128 = vmatpush.bf16.msra.mxu1 %v258_v1  ;;  %v257_v3 = vld [vmem:[%s415_s3 + $0x10] sm:$0xff]  ;;  %v256_v5 = vld [vmem:[%s415_s3 + $0x8] sm:$0xff]  ;;  %s327_s28 = smov [#allocation5]   ;;  %s200_s8 = sshll.u32 %s419_s7, 4  ;;  %vm191_vm2 = vcmask 130048   ;;  %s201_s8 = int_to_ptr.hbm [resolvable:$true] %s200_s8 }
   0x8   :  { %v44_v4 = vld [vmem:[%s412_s0] sm:$0xf]  ;;  %v262_v7 = vld [vmem:[%s417_s5 + $0x18] sm:$0xff]  ;;  %v261_v14 = vld [vmem:[%s417_s5 + $0x10] sm:$0xff]  ;;  %s198_s29 = sshll.u32 %s327_s28, 4  ;;  %s199_s29 = int_to_ptr.vmem [resolvable:$true] %s198_s29 }
   0x9   :  { %v255_v6 = vld [vmem:[%s415_s3] sm:$0xff]  ;;  %182 = vmatpush.bf16.msra.mxu2 %v262_v7  ;;  %v260_v15 = vld [vmem:[%s417_s5 + $0x8] sm:$0xff] }
   0xa   :  { %v267_v8 = vld [vmem:[%s414_s2] ss:$0 sm:$0xff] }
   0xb   :  { %76 = vmatpush.bf16.msra.mxu0 %v253_v2  ;;  %129 = vmatpush.bf16.msra.mxu1 %v257_v3  ;;  %v259_v16 = vld [vmem:[%s417_s5] sm:$0xff] }
   0xc   :  { %v268_v17 = vld [vmem:[%s416_s4] ss:$0 sm:$0xff] }
   0xd   :  { %183 = vmatpush.bf16.msra.mxu2 %v261_v14  ;;  %v269_v23 = vld [vmem:[%s418_s6] ss:$0 sm:$0xff] }
   0xe   :  { %218 = vmatmul.msk.bf16.vlgmr.msra.gmra.mxu0 %vm65_vm0, %v44_v4 }
   0xf   :  { %130 = vmatpush.bf16.msra.mxu1 %v256_v5 }
  0x11   :  { %184 = vmatpush.bf16.msra.mxu2 %v260_v15 }
  0x13   :  { %131 = vmatpush.bf16.msra.mxu1 %v255_v6 }
  0x15   :  { %185 = vmatpush.bf16.msra.mxu2 %v259_v16 }
  0x8b   :  { %v78_v9 = vpop.f32.mrf.mxu0 }
  0x8c   :  { %v79_v10 = vadd.f32 %v267_v8, %v78_v9 }
  0x8e   :  { %v82_v11 = vmax.f32 %v79_v10, 0.0 }
  0x90   :  { %v83_v12 = vpack.c.bf16 %v82_v11, %v82_v11 }
  0x92   :  { %235 = vmatmul.msk.bf16.vlgmr.msra.gmra.mxu1 %vm120_vm1, %v83_v12 }
  0x93   :  { %v80_v13 = vpop.f32.mrf.mxu0 }
 0x10f   :  { %v133_v18 = vpop.f32.mrf.mxu1 }
 0x110   :  { %v134_v19 = vadd.f32 %v268_v17, %v133_v18 }
 0x112   :  { %270 = vtanh.f32 %v134_v19 }
 0x117   :  { %v135_v20 = vpop.f32.mrf.mxu1 }
 0x118   :  { %v271_v21 = vpop.eup %270 }
 0x119   :  { %v138_v22 = vpack.c.bf16 %v271_v21, %v271_v21 }
 0x11b   :  { %252 = vmatmul.msk.bf16.vlgmr.msra.gmra.mxu2 %vm120_vm1, %v138_v22 }
 0x19e   :  { %v187_v24 = vpop.f32.mrf.mxu2 }
 0x19f   :  { %v188_v25 = vadd.f32 %v269_v23, %v187_v24 }
 0x1a1   :  { %192 = vst.msk [vmem:[#allocation5] sm:$0xff] %vm191_vm2, %v188_v25 }
 0x1a2   :  { %203 = dma.vmem_to_hbm [thread:$0]  %s199_s29, 128, %s201_s8, [#allocation4]  }
 0x1a6   :  { %v189_v26 = vpop.f32.mrf.mxu2 }
 0x1a7   :  { %322 = dma.done.wait [#allocation4], 128  }
 0x1a8   :  { %323 = vsyncadd [#allocation4], 4294967168 }
 0x1a9   :  { %208 = vsyncpa [#allocation3], 1 }
 0x1aa   :  { %209 = vsyncpa [#allocation4], 1 }

</bundles_post_ra>
